<compile_context>
chip_gen: v7x
topology: tpu7x:2x2x1
jax: 0.10.0
libtpu: 0.0.40
codegen_flags: <defaults>
</compile_context>

<pallas_src>
import functools

import jax
import jax.numpy as jnp
from jax import lax
from jax.experimental import pallas as pl
from jax.experimental.pallas import tpu as pltpu


def _round_up(x, m):
    return ((x + m - 1) // m) * m


def _byol_kernel(op1_ref, op2_ref, tp1_ref, tp2_ref, out_ref, *, total_rows):
    """One grid step: a (tb, D) row tile of each input -> one partial loss sum."""
    tb, d = op1_ref.shape
    i = pl.program_id(0)

    eps = jnp.float32(1e-12)          # F.normalize default eps
    eps2 = eps * eps

    # All-ones RHS so the per-row lane reductions run on the (otherwise idle)
    # MXU instead of the XLU.  bf16 operands -> guaranteed single-pass matmul.
    ones_bf = jnp.ones((d, 128), jnp.bfloat16)
    dn = (((1,), (0,)), ((), ()))

    def rowsum(p):
        """sum(p, axis=-1, keepdims=True) on the MXU at ~f32 accuracy.

        Split the f32 operand into bf16 hi + lo parts (2-term split); each
        bf16 x ones(bf16) product is exact and accumulated in f32, so the only
        loss vs. a plain f32 lane reduction is the ~2^-18 relative split
        residual.  Keeps the 2 XLUs (v6e/v7x) off the critical path.
        """
        hi = p.astype(jnp.bfloat16)
        lo = (p - hi.astype(jnp.float32)).astype(jnp.bfloat16)
        s = lax.dot_general(hi, ones_bf, dn, preferred_element_type=jnp.float32)
        s = s + lax.dot_general(lo, ones_bf, dn, preferred_element_type=jnp.float32)
        return s[:, :1]               # all 128 output lanes are identical

    def pair_cos(x_ref, y_ref):
        """Per-row cosine similarity of F.normalize(x) and F.normalize(y)."""
        x = x_ref[...].astype(jnp.float32)
        y = y_ref[...].astype(jnp.float32)
        s_xy = rowsum(x * y)
        n_x = jnp.maximum(rowsum(x * x), eps2)
        n_y = jnp.maximum(rowsum(y * y), eps2)
        # rsqrt per norm on (tb, 1) only (EUP, essentially free); avoids f32
        # overflow of n_x * n_y and matches the reference's clamped division.
        return s_xy * (lax.rsqrt(n_x) * lax.rsqrt(n_y))

    # Finish the (opred1, tproj2) pair before touching (opred2, tproj1) so at
    # most a handful of tile-sized f32 temporaries are live at once.
    cos_1 = pair_cos(op1_ref, tp2_ref)
    cos_2 = pair_cos(op2_ref, tp1_ref)

    # 0.5*(2 - 2*cos_1) + 0.5*(2 - 2*cos_2) == 2 - cos_1 - cos_2
    row_loss = jnp.float32(2.0) - (cos_1 + cos_2)            # (tb, 1)

    # Mask rows past the true batch (last tile may read unspecified padding).
    # TODO(synk): if a backward pass is ever added, zero-mask the *inputs* for
    # rows >= total_rows too, so AD cannot leak NaNs from padded rows.
    row_idx = i * tb + lax.broadcasted_iota(jnp.int32, (tb, 1), 0)
    row_loss = jnp.where(row_idx < total_rows, row_loss, jnp.float32(0.0))

    out_ref[0, 0] = jnp.sum(row_loss)


def _choose_tb(B, D, itemsize, *, budget_bytes=24 << 20, want_steps=4):
    """Pick the row-tile size.

    Budgets against the real input dtype (4 inputs x 2 pipeline buffers) plus
    ~6 tile-sized f32 temporaries (casts / products / split operands), and
    caps the tile so large batches still give the "parallel" grid axis a few
    steps (v7x megacore sharding across 2 TensorCores).
    """
    align = max(8, 32 // max(1, itemsize))        # 8 for f32, 16 for bf16
    b_pad = _round_up(B, align)
    per_row = 4 * 2 * D * itemsize                # double-buffered inputs
    per_row += 6 * D * 4                          # in-kernel f32 temporaries
    tb = max(align, budget_bytes // per_row)
    tb = min(tb, 2048)                            # diminishing returns past ~2k rows
    tb = min(tb, max(256, _round_up(pl.cdiv(B, want_steps), align)))
    tb = min(tb, b_pad)
    return max(align, (tb // align) * align)


def byol_loss_pallas(opred1, opred2, tproj1, tproj2, *, tb=None):
    """Pallas BYOL loss.  Inputs: (B, D) float arrays (f32 or bf16) -> scalar f32."""
    B, D = opred1.shape
    itemsize = jnp.dtype(opred1.dtype).itemsize
    if tb is None:
        tb = _choose_tb(B, D, itemsize)
    else:
        tb = max(8, (min(tb, _round_up(B, 8)) // 8) * 8)
    grid = (pl.cdiv(B, tb),)

    row_spec = pl.BlockSpec((tb, D), lambda i: (i, 0))

    partials = pl.pallas_call(
        functools.partial(_byol_kernel, total_rows=B),
        out_shape=jax.ShapeDtypeStruct((grid[0], 1), jnp.float32),
        grid=grid,
        in_specs=[row_spec, row_spec, row_spec, row_spec],
        out_specs=pl.BlockSpec((1, 1), lambda i: (i, 0),
                               memory_space=pltpu.SMEM),
        compiler_params=pltpu.CompilerParams(
            dimension_semantics=("parallel",),    # independent partial sums
            vmem_limit_bytes=40 << 20,
        ),
    )(opred1, opred2, tproj1, tproj2)

    # Final reduction + mean outside the kernel (tiny, keeps the grid axis
    # fully parallel for multi-TensorCore chips).
    return jnp.sum(partials) / jnp.float32(B)


def byol_loss_ref(opred1, opred2, tproj1, tproj2):
    """Pure-JAX reference mirroring the PyTorch module (detach is a fwd no-op)."""
    eps = 1e-12

    def norm(x):
        n = jnp.sqrt(jnp.sum(x * x, axis=-1, keepdims=True))
        return x / jnp.maximum(n, eps)

    a, b = norm(opred1), norm(opred2)
    c, d = norm(tproj1), norm(tproj2)
    lp1 = 2.0 - 2.0 * jnp.sum(a * d, axis=-1)
    lp2 = 2.0 - 2.0 * jnp.sum(b * c, axis=-1)
    return jnp.mean(0.5 * lp1 + 0.5 * lp2)


if __name__ == "__main__":
    # Small, BYOL-shaped inputs: batch=16, prediction/projection dim=128.
    key = jax.random.PRNGKey(0)
    k1, k2, k3, k4 = jax.random.split(key, 4)
    B, D = 16, 128
    opred1 = jax.random.normal(k1, (B, D), dtype=jnp.float32)
    opred2 = jax.random.normal(k2, (B, D), dtype=jnp.float32)
    tproj1 = jax.random.normal(k3, (B, D), dtype=jnp.float32)
    tproj2 = jax.random.normal(k4, (B, D), dtype=jnp.float32)

    loss = jax.block_until_ready(byol_loss_pallas(opred1, opred2, tproj1, tproj2))
    ref = byol_loss_ref(opred1, opred2, tproj1, tproj2)
    assert jnp.allclose(loss, ref, atol=2e-5, rtol=2e-5), (loss, ref)

    # bf16 inputs are accepted directly (halves HBM traffic).  Compare against
    # the f32 reference evaluated on the same bf16-quantized values.
    bf = lambda x: x.astype(jnp.bfloat16)
    loss_bf16 = jax.block_until_ready(
        byol_loss_pallas(bf(opred1), bf(opred2), bf(tproj1), bf(tproj2)))
    ref_bf16 = byol_loss_ref(bf(opred1).astype(jnp.float32),
                             bf(opred2).astype(jnp.float32),
                             bf(tproj1).astype(jnp.float32),
                             bf(tproj2).astype(jnp.float32))
    assert jnp.allclose(loss_bf16, ref_bf16, atol=1e-4, rtol=1e-4), (loss_bf16, ref_bf16)

    print("KERNEL_OK")
</pallas_src>

<mosaic_0001>
module attributes {stable_mosaic.version = 11 : i64} {
  func.func @_byol_kernel(%arg0: i32, %arg1: memref<16x128xf32, #tpu.memory_space<vmem>>, %arg2: memref<16x128xf32, #tpu.memory_space<vmem>>, %arg3: memref<16x128xf32, #tpu.memory_space<vmem>>, %arg4: memref<16x128xf32, #tpu.memory_space<vmem>>, %arg5: memref<1x1xf32, #tpu.memory_space<smem>>) attributes {dimension_semantics = [#tpu.dimension_semantics<parallel>], iteration_bounds = array<i64: 1>, scalar_prefetch = 0 : i64, scratch_operands = 0 : i64, tpu.core_type = #tpu.core_type<tc>, window_params = [{transform_indices = @transform_0, window_bounds = array<i64: 16, 128>}, {transform_indices = @transform_1, window_bounds = array<i64: 16, 128>}, {transform_indices = @transform_2, window_bounds = array<i64: 16, 128>}, {transform_indices = @transform_3, window_bounds = array<i64: 16, 128>}, {transform_indices = @transform_4, window_bounds = array<i64: 1, 1>}]} {
    %cst = arith.constant 9.99999996E-13 : f32
    %cst_0 = arith.constant 9.99999996E-13 : f32
    %0 = arith.mulf %cst, %cst_0 : f32
    %cst_1 = arith.constant 1.000000e+00 : bf16
    %1 = vector.broadcast %cst_1 : bf16 to vector<128x128xbf16>
    %c0 = arith.constant 0 : index
    %c0_2 = arith.constant 0 : index
    %2 = vector.load %arg1[%c0, %c0_2] : memref<16x128xf32, #tpu.memory_space<vmem>>, vector<16x128xf32>
    %c0_3 = arith.constant 0 : index
    %c0_4 = arith.constant 0 : index
    %3 = vector.load %arg4[%c0_3, %c0_4] : memref<16x128xf32, #tpu.memory_space<vmem>>, vector<16x128xf32>
    %4 = arith.mulf %2, %3 : vector<16x128xf32>
    %5 = arith.truncf %4 : vector<16x128xf32> to vector<16x128xbf16>
    %6 = arith.extf %5 : vector<16x128xbf16> to vector<16x128xf32>
    %7 = arith.subf %4, %6 : vector<16x128xf32>
    %8 = arith.truncf %7 : vector<16x128xf32> to vector<16x128xbf16>
    %cst_5 = arith.constant dense<0.000000e+00> : vector<16x128xf32>
    %9 = tpu.matmul %5, %1, %cst_5 {dimension_numbers = #tpu.dot_dimension_numbers<[1], [0], [0], [1], [0, 0, 1, 1], [], []>} : vector<16x128xbf16>, vector<128x128xbf16>, vector<16x128xf32> -> vector<16x128xf32>
    %cst_6 = arith.constant dense<0.000000e+00> : vector<16x128xf32>
    %10 = tpu.matmul %8, %1, %cst_6 {dimension_numbers = #tpu.dot_dimension_numbers<[1], [0], [0], [1], [0, 0, 1, 1], [], []>} : vector<16x128xbf16>, vector<128x128xbf16>, vector<16x128xf32> -> vector<16x128xf32>
    %11 = arith.addf %9, %10 : vector<16x128xf32>
    %12 = vector.extract_strided_slice %11 {offsets = [0, 0], sizes = [16, 1], strides = [1, 1]} : vector<16x128xf32> to vector<16x1xf32>
    %13 = arith.mulf %2, %2 : vector<16x128xf32>
    %14 = arith.truncf %13 : vector<16x128xf32> to vector<16x128xbf16>
    %15 = arith.extf %14 : vector<16x128xbf16> to vector<16x128xf32>
    %16 = arith.subf %13, %15 : vector<16x128xf32>
    %17 = arith.truncf %16 : vector<16x128xf32> to vector<16x128xbf16>
    %cst_7 = arith.constant dense<0.000000e+00> : vector<16x128xf32>
    %18 = tpu.matmul %14, %1, %cst_7 {dimension_numbers = #tpu.dot_dimension_numbers<[1], [0], [0], [1], [0, 0, 1, 1], [], []>} : vector<16x128xbf16>, vector<128x128xbf16>, vector<16x128xf32> -> vector<16x128xf32>
    %cst_8 = arith.constant dense<0.000000e+00> : vector<16x128xf32>
    %19 = tpu.matmul %17, %1, %cst_8 {dimension_numbers = #tpu.dot_dimension_numbers<[1], [0], [0], [1], [0, 0, 1, 1], [], []>} : vector<16x128xbf16>, vector<128x128xbf16>, vector<16x128xf32> -> vector<16x128xf32>
    %20 = arith.addf %18, %19 : vector<16x128xf32>
    %21 = vector.extract_strided_slice %20 {offsets = [0, 0], sizes = [16, 1], strides = [1, 1]} : vector<16x128xf32> to vector<16x1xf32>
    %22 = vector.broadcast %0 : f32 to vector<16x1xf32>
    %23 = arith.maximumf %21, %22 : vector<16x1xf32>
    %24 = arith.mulf %3, %3 : vector<16x128xf32>
    %25 = arith.truncf %24 : vector<16x128xf32> to vector<16x128xbf16>
    %26 = arith.extf %25 : vector<16x128xbf16> to vector<16x128xf32>
    %27 = arith.subf %24, %26 : vector<16x128xf32>
    %28 = arith.truncf %27 : vector<16x128xf32> to vector<16x128xbf16>
    %cst_9 = arith.constant dense<0.000000e+00> : vector<16x128xf32>
    %29 = tpu.matmul %25, %1, %cst_9 {dimension_numbers = #tpu.dot_dimension_numbers<[1], [0], [0], [1], [0, 0, 1, 1], [], []>} : vector<16x128xbf16>, vector<128x128xbf16>, vector<16x128xf32> -> vector<16x128xf32>
    %cst_10 = arith.constant dense<0.000000e+00> : vector<16x128xf32>
    %30 = tpu.matmul %28, %1, %cst_10 {dimension_numbers = #tpu.dot_dimension_numbers<[1], [0], [0], [1], [0, 0, 1, 1], [], []>} : vector<16x128xbf16>, vector<128x128xbf16>, vector<16x128xf32> -> vector<16x128xf32>
    %31 = arith.addf %29, %30 : vector<16x128xf32>
    %32 = vector.extract_strided_slice %31 {offsets = [0, 0], sizes = [16, 1], strides = [1, 1]} : vector<16x128xf32> to vector<16x1xf32>
    %33 = vector.broadcast %0 : f32 to vector<16x1xf32>
    %34 = arith.maximumf %32, %33 : vector<16x1xf32>
    %35 = math.rsqrt %23 : vector<16x1xf32>
    %36 = math.rsqrt %34 : vector<16x1xf32>
    %37 = arith.mulf %35, %36 : vector<16x1xf32>
    %38 = arith.mulf %12, %37 : vector<16x1xf32>
    %c0_11 = arith.constant 0 : index
    %c0_12 = arith.constant 0 : index
    %39 = vector.load %arg2[%c0_11, %c0_12] : memref<16x128xf32, #tpu.memory_space<vmem>>, vector<16x128xf32>
    %c0_13 = arith.constant 0 : index
    %c0_14 = arith.constant 0 : index
    %40 = vector.load %arg3[%c0_13, %c0_14] : memref<16x128xf32, #tpu.memory_space<vmem>>, vector<16x128xf32>
    %41 = arith.mulf %39, %40 : vector<16x128xf32>
    %42 = arith.truncf %41 : vector<16x128xf32> to vector<16x128xbf16>
    %43 = arith.extf %42 : vector<16x128xbf16> to vector<16x128xf32>
    %44 = arith.subf %41, %43 : vector<16x128xf32>
    %45 = arith.truncf %44 : vector<16x128xf32> to vector<16x128xbf16>
    %cst_15 = arith.constant dense<0.000000e+00> : vector<16x128xf32>
    %46 = tpu.matmul %42, %1, %cst_15 {dimension_numbers = #tpu.dot_dimension_numbers<[1], [0], [0], [1], [0, 0, 1, 1], [], []>} : vector<16x128xbf16>, vector<128x128xbf16>, vector<16x128xf32> -> vector<16x128xf32>
    %cst_16 = arith.constant dense<0.000000e+00> : vector<16x128xf32>
    %47 = tpu.matmul %45, %1, %cst_16 {dimension_numbers = #tpu.dot_dimension_numbers<[1], [0], [0], [1], [0, 0, 1, 1], [], []>} : vector<16x128xbf16>, vector<128x128xbf16>, vector<16x128xf32> -> vector<16x128xf32>
    %48 = arith.addf %46, %47 : vector<16x128xf32>
    %49 = vector.extract_strided_slice %48 {offsets = [0, 0], sizes = [16, 1], strides = [1, 1]} : vector<16x128xf32> to vector<16x1xf32>
    %50 = arith.mulf %39, %39 : vector<16x128xf32>
    %51 = arith.truncf %50 : vector<16x128xf32> to vector<16x128xbf16>
    %52 = arith.extf %51 : vector<16x128xbf16> to vector<16x128xf32>
    %53 = arith.subf %50, %52 : vector<16x128xf32>
    %54 = arith.truncf %53 : vector<16x128xf32> to vector<16x128xbf16>
    %cst_17 = arith.constant dense<0.000000e+00> : vector<16x128xf32>
    %55 = tpu.matmul %51, %1, %cst_17 {dimension_numbers = #tpu.dot_dimension_numbers<[1], [0], [0], [1], [0, 0, 1, 1], [], []>} : vector<16x128xbf16>, vector<128x128xbf16>, vector<16x128xf32> -> vector<16x128xf32>
    %cst_18 = arith.constant dense<0.000000e+00> : vector<16x128xf32>
    %56 = tpu.matmul %54, %1, %cst_18 {dimension_numbers = #tpu.dot_dimension_numbers<[1], [0], [0], [1], [0, 0, 1, 1], [], []>} : vector<16x128xbf16>, vector<128x128xbf16>, vector<16x128xf32> -> vector<16x128xf32>
    %57 = arith.addf %55, %56 : vector<16x128xf32>
    %58 = vector.extract_strided_slice %57 {offsets = [0, 0], sizes = [16, 1], strides = [1, 1]} : vector<16x128xf32> to vector<16x1xf32>
    %59 = vector.broadcast %0 : f32 to vector<16x1xf32>
    %60 = arith.maximumf %58, %59 : vector<16x1xf32>
    %61 = arith.mulf %40, %40 : vector<16x128xf32>
    %62 = arith.truncf %61 : vector<16x128xf32> to vector<16x128xbf16>
    %63 = arith.extf %62 : vector<16x128xbf16> to vector<16x128xf32>
    %64 = arith.subf %61, %63 : vector<16x128xf32>
    %65 = arith.truncf %64 : vector<16x128xf32> to vector<16x128xbf16>
    %cst_19 = arith.constant dense<0.000000e+00> : vector<16x128xf32>
    %66 = tpu.matmul %62, %1, %cst_19 {dimension_numbers = #tpu.dot_dimension_numbers<[1], [0], [0], [1], [0, 0, 1, 1], [], []>} : vector<16x128xbf16>, vector<128x128xbf16>, vector<16x128xf32> -> vector<16x128xf32>
    %cst_20 = arith.constant dense<0.000000e+00> : vector<16x128xf32>
    %67 = tpu.matmul %65, %1, %cst_20 {dimension_numbers = #tpu.dot_dimension_numbers<[1], [0], [0], [1], [0, 0, 1, 1], [], []>} : vector<16x128xbf16>, vector<128x128xbf16>, vector<16x128xf32> -> vector<16x128xf32>
    %68 = arith.addf %66, %67 : vector<16x128xf32>
    %69 = vector.extract_strided_slice %68 {offsets = [0, 0], sizes = [16, 1], strides = [1, 1]} : vector<16x128xf32> to vector<16x1xf32>
    %70 = vector.broadcast %0 : f32 to vector<16x1xf32>
    %71 = arith.maximumf %69, %70 : vector<16x1xf32>
    %72 = math.rsqrt %60 : vector<16x1xf32>
    %73 = math.rsqrt %71 : vector<16x1xf32>
    %74 = arith.mulf %72, %73 : vector<16x1xf32>
    %75 = arith.mulf %49, %74 : vector<16x1xf32>
    %76 = arith.addf %38, %75 : vector<16x1xf32>
    %cst_21 = arith.constant 2.000000e+00 : f32
    %77 = vector.broadcast %cst_21 : f32 to vector<16x1xf32>
    %78 = arith.subf %77, %76 : vector<16x1xf32>
    %c16_i32 = arith.constant 16 : i32
    %79 = arith.muli %arg0, %c16_i32 : i32
    %80 = tpu.iota {dimensions = array<i32: 0>} : vector<16x1xi32>
    %81 = vector.broadcast %79 : i32 to vector<16x1xi32>
    %82 = arith.addi %81, %80 : vector<16x1xi32>
    %c16_i32_22 = arith.constant 16 : i32
    %83 = vector.broadcast %c16_i32_22 : i32 to vector<16x1xi32>
    %84 = arith.cmpi slt, %82, %83 : vector<16x1xi32>
    %cst_23 = arith.constant 0.000000e+00 : f32
    %85 = vector.broadcast %cst_23 : f32 to vector<16x1xf32>
    %86 = arith.select %84, %78, %85 : vector<16x1xi1>, vector<16x1xf32>
    %87 = vector.shape_cast %86 : vector<16x1xf32> to vector<1x16x1xf32>
    %cst_24 = arith.constant dense<0.000000e+00> : vector<1xf32>
    %88 = vector.multi_reduction <add>, %87, %cst_24 [1, 2] : vector<1x16x1xf32> to vector<1xf32>
    %89 = vector.shape_cast %88 : vector<1xf32> to vector<1x1x1xf32>
    %90 = vector.extract %89[0, 0, 0] : f32 from vector<1x1x1xf32>
    %c0_25 = arith.constant 0 : index
    %c0_26 = arith.constant 0 : index
    %91 = memref.load %arg5[%c0_25, %c0_26] : memref<1x1xf32, #tpu.memory_space<smem>>
    memref.store %90, %arg5[%c0_25, %c0_26] : memref<1x1xf32, #tpu.memory_space<smem>>
    return
  }
  func.func @transform_0(%arg0: i32) -> (i32, i32) {
    %c0_i32 = arith.constant 0 : i32
    %c0_i32_0 = arith.constant 0 : i32
    return %arg0, %c0_i32 : i32, i32
  }
  func.func @transform_1(%arg0: i32) -> (i32, i32) {
    %c0_i32 = arith.constant 0 : i32
    %c0_i32_0 = arith.constant 0 : i32
    return %arg0, %c0_i32 : i32, i32
  }
  func.func @transform_2(%arg0: i32) -> (i32, i32) {
    %c0_i32 = arith.constant 0 : i32
    %c0_i32_0 = arith.constant 0 : i32
    return %arg0, %c0_i32 : i32, i32
  }
  func.func @transform_3(%arg0: i32) -> (i32, i32) {
    %c0_i32 = arith.constant 0 : i32
    %c0_i32_0 = arith.constant 0 : i32
    return %arg0, %c0_i32 : i32, i32
  }
  func.func @transform_4(%arg0: i32) -> (i32, i32) {
    %c0_i32 = arith.constant 0 : i32
    %c0_i32_0 = arith.constant 0 : i32
    return %arg0, %c0_i32 : i32, i32
  }
}

</mosaic_0001>

<bundles_post_ra>
// kernel: tpu_custom_call.1
= control target key start
LH: loop header
LB: loop body
LE: loop exit
PB: predicated region body
PF: predicated region fallthrough
CT: control target
= control target key end

     0   :  { %9 = vsyncpa [#allocation3], 0  ;;  %s1608_s0 = inlined_call_operand.hbm [shape: f32[16,128], index: 0, kind: input, shape index: {}]   ;;  %s1609_s1 = inlined_call_operand.hbm [shape: f32[16,128], index: 1, kind: input, shape index: {}]   ;;  %s1610_s2 = inlined_call_operand.hbm [shape: f32[16,128], index: 2, kind: input, shape index: {}]   ;;  %s1611_s3 = inlined_call_operand.hbm [shape: f32[16,128], index: 3, kind: input, shape index: {}]   ;;  %s1612_s4 = inlined_call_operand.hbm [shape: f32[1,1], index: 4, kind: output, shape index: {}]  }
   0x1   :  { %10 = vsyncpa [#allocation6], 0 }
   0x2   :  { %11 = vsyncpa [#allocation9], 0 }
   0x3   :  { %12 = vsyncpa [#allocation4], 0  ;;  %s1199_s15 = smov [#allocation5]   ;;  %s1200_s17 = smov [#allocation2]  }
   0x4   :  { %s30_s16 = sshll.u32 %s1199_s15, 4  ;;  %s18_s18 = sshll.u32 %s1200_s17, 4  ;;  %s31_s16 = int_to_ptr.vmem [resolvable:$true] %s30_s16  ;;  %s1234_s18 = int_to_ptr.vmem [resolvable:$true] %s18_s18 }
   0x5   :  { %s1093_s21 = scalar_lea.hbm %s1609_s1, 256 }
   0x6   :  { %p1094_p0 = scmp.ne.s32.totalorder %s1609_s1, %s1093_s21  ;;  %p1097_p1 = scmp.lt.u32.totalorder %s1093_s21, %s1609_s1 }
   0x8   :  { %p1099_p2 = pnand %p1097_p1, %p1094_p0 }
   0xa   :  { %1102 = shalt.err (!%p1099_p2)
}
   0xb   :  { %s1103_s26 = scalar_lea.vmem %s31_s16, 256  ;;  %p1108_p4 = scmp.lt.s32.totalorder %s31_s16, %s31_s16 }
   0xc   :  { %p1104_p3 = scmp.ne.s32.totalorder %s31_s16, %s1103_s26  ;;  %p1109_p5 = scmp.lt.s32.totalorder %s1103_s26, %s1103_s26 }
   0xe   :  { %p1110_p6 = por %p1109_p5, %p1108_p4 }
  0x10   :  { %p1111_p7 = pnand %p1110_p6, %p1104_p3 }
  0x12   :  { %1114 = shalt.err (!%p1111_p7)
}
  0x13   :  { %s1201_s27 = smov 128   ;;  %s1202_s28 = smov 8  }
  0x14   :  { %36 = dma.hbm_to_vmem [thread:$0]  %s1609_s1, 256, %s31_s16, [#allocation6], %s1201_s27, %s1201_s27, %s1202_s28  }
  0x15   :  { %s1115_s7 = scalar_lea.hbm %s1608_s0, 256 }
  0x16   :  { %p1116_p8 = scmp.ne.s32.totalorder %s1608_s0, %s1115_s7  ;;  %p1119_p9 = scmp.lt.u32.totalorder %s1115_s7, %s1608_s0 }
  0x18   :  { %p1121_p10 = pnand %p1119_p9, %p1116_p8 }
  0x1a   :  { %1124 = shalt.err (!%p1121_p10)
}
  0x1b   :  { %s1125_s12 = scalar_lea.vmem %s1234_s18, 256  ;;  %p1130_p12 = scmp.lt.s32.totalorder %s1234_s18, %s1234_s18 }
  0x1c   :  { %p1126_p11 = scmp.ne.s32.totalorder %s1234_s18, %s1125_s12  ;;  %p1131_p13 = scmp.lt.s32.totalorder %s1125_s12, %s1125_s12 }
  0x1e   :  { %p1132_p0 = por %p1131_p13, %p1130_p12 }
  0x20   :  { %p1133_p1 = pnand %p1132_p0, %p1126_p11 }
  0x22   :  { %1136 = shalt.err (!%p1133_p1)
}
  0x23   :  { %24 = dma.hbm_to_vmem [thread:$0]  %s1608_s0, 256, %s1234_s18, [#allocation3], %s1201_s27, %s1201_s27, %s1202_s28  }
  0x24   :  { %s1203_s14 = smov [#allocation7]   ;;  %s1204_s16 = smov [#allocation8]  }
  0x25   :  { %s42_s15 = sshll.u32 %s1203_s14, 4  ;;  %s54_s17 = sshll.u32 %s1204_s16, 4  ;;  %s43_s15 = int_to_ptr.vmem [resolvable:$true] %s42_s15  ;;  %s1271_s17 = int_to_ptr.vmem [resolvable:$true] %s54_s17 }
  0x26   :  { %s1137_s21 = scalar_lea.hbm %s1610_s2, 256 }
  0x27   :  { %p1138_p2 = scmp.ne.s32.totalorder %s1610_s2, %s1137_s21  ;;  %p1141_p3 = scmp.lt.u32.totalorder %s1137_s21, %s1610_s2 }
  0x29   :  { %p1143_p4 = pnand %p1141_p3, %p1138_p2 }
  0x2b   :  { %1146 = shalt.err (!%p1143_p4)
}
  0x2c   :  { %s1147_s0 = scalar_lea.vmem %s43_s15, 256  ;;  %p1152_p6 = scmp.lt.s32.totalorder %s43_s15, %s43_s15 }
  0x2d   :  { %p1148_p5 = scmp.ne.s32.totalorder %s43_s15, %s1147_s0  ;;  %p1153_p7 = scmp.lt.s32.totalorder %s1147_s0, %s1147_s0 }
  0x2f   :  { %p1154_p8 = por %p1153_p7, %p1152_p6 }
  0x31   :  { %p1155_p9 = pnand %p1154_p8, %p1148_p5 }
  0x33   :  { %1158 = shalt.err (!%p1155_p9)
}
  0x34   :  { %48 = dma.hbm_to_vmem [thread:$0]  %s1610_s2, 256, %s43_s15, [#allocation6], %s1201_s27, %s1201_s27, %s1202_s28  }
  0x35   :  { %s1159_s5 = scalar_lea.hbm %s1611_s3, 256 }
  0x36   :  { %p1160_p10 = scmp.ne.s32.totalorder %s1611_s3, %s1159_s5  ;;  %p1163_p11 = scmp.lt.u32.totalorder %s1159_s5, %s1611_s3 }
  0x38   :  { %p1165_p12 = pnand %p1163_p11, %p1160_p10 }
  0x3a   :  { %1168 = shalt.err (!%p1165_p12)
}
  0x3b   :  { %s1169_s10 = scalar_lea.vmem %s1271_s17, 256  ;;  %p1174_p0 = scmp.lt.s32.totalorder %s1271_s17, %s1271_s17 }
  0x3c   :  { %p1170_p13 = scmp.ne.s32.totalorder %s1271_s17, %s1169_s10  ;;  %p1175_p1 = scmp.lt.s32.totalorder %s1169_s10, %s1169_s10 }
  0x3e   :  { %p1176_p2 = por %p1175_p1, %p1174_p0 }
  0x40   :  { %p1177_p3 = pnand %p1176_p2, %p1170_p13 }
  0x42   :  { %1180 = shalt.err (!%p1177_p3)
}
  0x43   :  { %60 = dma.hbm_to_vmem [thread:$0]  %s1611_s3, 256, %s1271_s17, [#allocation9], %s1201_s27, %s1201_s27, %s1202_s28  }
  0x44   :  { %1191 = dma.done.wait [#allocation3], 256  }
  0x45   :  { %1192 = vsyncadd [#allocation3], 4294967040 }
  0x46   :  { %1193 = dma.done.wait [#allocation6], 512  }
  0x47   :  { %1194 = vsyncadd [#allocation6], 4294966784 }
  0x48   :  { %1195 = dma.done.wait [#allocation9], 256  }
  0x49   :  { %1196 = vsyncadd [#allocation9], 4294967040  ;;  %v1205_v0 = vmov 0.0   ;;  %v1206_v1 = vmov 1065369472   ;;  %vm1207_vm0 = vmmov 0  }
  0x4a   :  { %801 = vmatprep.subr.bf16.mxu0 %v1205_v0  ;;  %841 = vmatprep.subr.bf16.mxu1 %v1205_v0  ;;  %v77_v2 = vld [vmem:[#allocation8] sm:$0xff]  ;;  %v78_v3 = vld [vmem:[#allocation8 + $0x8] sm:$0xff]  ;;  %v75_v5 = vld [vmem:[#allocation2] sm:$0xff]  ;;  %vm662_vm1 = vcmask 7168   ;;  %s1181_s12 = scalar_lea.hbm %s1612_s4, 16 }
  0x4b   :  { %802 = vmatpush3.bf16.msra.mxu0 %v1206_v1  ;;  %842 = vmatpush3.bf16.msra.mxu1 %v1206_v1  ;;  %v261_v4 = vmul.f32 %v77_v2, %v77_v2  ;;  %v262_v6 = vmul.f32 %v78_v3, %v78_v3  ;;  %v76_v7 = vld [vmem:[#allocation2 + $0x8] sm:$0xff]  ;;  %v79_v9 = vmul.f32 %v77_v2, %v75_v5  ;;  %v1354_v24 = vld [vmem:[#allocation5] sm:$0xff]  ;;  %v1358_v25 = vld [vmem:[#allocation5 + $0x8] sm:$0xff]  ;;  %p1182_p4 = scmp.ne.s32.totalorder %s1612_s4, %s1181_s12  ;;  %p1185_p5 = scmp.lt.u32.totalorder %s1181_s12, %s1612_s4 }
  0x4c   :  { %803 = vmatprep.subr.bf16.mxu0 %v1205_v0  ;;  %843 = vmatprep.subr.bf16.mxu1 %v1205_v0  ;;  %v169_v10 = vmul.f32 %v75_v5, %v75_v5  ;;  %v80_v11 = vmul.f32 %v78_v3, %v76_v7  ;;  %v170_v12 = vmul.f32 %v76_v7, %v76_v7  ;;  %v1360_v26 = vld [vmem:[#allocation7] sm:$0xff]  ;;  %v1362_v27 = vld [vmem:[#allocation7 + $0x8] sm:$0xff] }
  0x4d   :  { %817 = vmatprep.mubr.msk.bf16.mxu0 %vm1207_vm0, %v1205_v0  ;;  %857 = vmatprep.mubr.msk.bf16.mxu1 %vm1207_vm0, %v1205_v0  ;;  %v1326_v8 = vpack.c.bf16 %v262_v6, %v261_v4  ;;  %v455_v28 = vmul.f32 %v1354_v24, %v1354_v24  ;;  %v456_v29 = vmul.f32 %v1358_v25, %v1358_v25  ;;  %p1187_p6 = pnand %p1185_p5, %p1182_p4 }
  0x4e   :  { %v1338_v17 = vpack.c.bf16 %v80_v11, %v79_v9  ;;  %v1340_v18 = vpack.c.bf16 %v170_v12, %v169_v10  ;;  %v547_v30 = vmul.f32 %v1360_v26, %v1360_v26  ;;  %v548_v31 = vmul.f32 %v1362_v27, %v1362_v27 }
  0x4f   :  { %804 = vmatpush3.bf16.msra.mxu0 %v1206_v1  ;;  %844 = vmatpush3.bf16.msra.mxu1 %v1206_v1  ;;  %v264_v13 = vunpack.c.l.bf16 %v1326_v8  ;;  %v265_v14 = vunpack.c.h.bf16 %v1326_v8  ;;  %v1374_v36 = vpack.c.bf16 %v456_v29, %v455_v28  ;;  %v365_v50 = vmul.f32 %v1360_v26, %v1354_v24 }
  0x50   :  { %805 = vmatprep.subr.bf16.mxu0 %v1205_v0  ;;  %845 = vmatprep.subr.bf16.mxu1 %v1205_v0  ;;  %v82_v20 = vunpack.c.l.bf16 %v1338_v17  ;;  %v83_v21 = vunpack.c.h.bf16 %v1338_v17  ;;  %v172_v22 = vunpack.c.l.bf16 %v1340_v18  ;;  %v173_v23 = vunpack.c.h.bf16 %v1340_v18 }
  0x51   :  { %v1334_v15 = vsub.f32 %v261_v4, %v264_v13  ;;  %v1336_v16 = vsub.f32 %v262_v6, %v265_v14  ;;  %v1376_v37 = vpack.c.bf16 %v548_v31, %v547_v30  ;;  %v458_v38 = vunpack.c.l.bf16 %v1374_v36 }
  0x52   :  { %v84_v32 = vsub.f32 %v79_v9, %v82_v20  ;;  %v85_v33 = vsub.f32 %v80_v11, %v83_v21  ;;  %v174_v34 = vsub.f32 %v169_v10, %v172_v22  ;;  %v175_v35 = vsub.f32 %v170_v12, %v173_v23 }
  0x53   :  { %806 = vmatpush3.bf16.msra.mxu0 %v1206_v1  ;;  %846 = vmatpush3.bf16.msra.mxu1 %v1206_v1  ;;  %v268_v19 = vpack.c.bf16 %v1336_v16, %v1334_v15  ;;  %v459_v39 = vunpack.c.h.bf16 %v1374_v36  ;;  %v550_v40 = vunpack.c.l.bf16 %v1376_v37  ;;  %v551_v41 = vunpack.c.h.bf16 %v1376_v37 }
  0x54   :  { %807 = vmatprep.subr.bf16.mxu0 %v1205_v0  ;;  %847 = vmatprep.subr.bf16.mxu1 %v1205_v0  ;;  %v86_v42 = vpack.c.bf16 %v85_v33, %v84_v32  ;;  %v176_v43 = vpack.c.bf16 %v175_v35, %v174_v34  ;;  %v1386_v44 = vsub.f32 %v455_v28, %v458_v38 }
  0x55   :  { %v1388_v45 = vsub.f32 %v456_v29, %v459_v39  ;;  %v1390_v46 = vsub.f32 %v547_v30, %v550_v40  ;;  %v1394_v47 = vsub.f32 %v548_v31, %v551_v41  ;;  %v366_v51 = vmul.f32 %v1362_v27, %v1358_v25 }
  0x57   :  { %808 = vmatpush3.bf16.msra.mxu0 %v1206_v1  ;;  %848 = vmatpush3.bf16.msra.mxu1 %v1206_v1  ;;  %v462_v48 = vpack.c.bf16 %v1388_v45, %v1386_v44  ;;  %v554_v49 = vpack.c.bf16 %v1394_v47, %v1390_v46  ;;  %v367_v52 = vpack.c.bf16 %v366_v51, %v365_v50 }
  0x58   :  { %809 = vmatprep.subr.bf16.mxu0 %v1205_v0  ;;  %849 = vmatprep.subr.bf16.mxu1 %v1205_v0 }
  0x59   :  { %v368_v53 = vunpack.c.l.bf16 %v367_v52  ;;  %v369_v54 = vunpack.c.h.bf16 %v367_v52 }
  0x5b   :  { %810 = vmatpush3.bf16.msra.mxu0 %v1206_v1  ;;  %850 = vmatpush3.bf16.msra.mxu1 %v1206_v1  ;;  %v370_v55 = vsub.f32 %v365_v50, %v368_v53  ;;  %v371_v56 = vsub.f32 %v366_v51, %v369_v54 }
  0x5c   :  { %811 = vmatprep.subr.bf16.mxu0 %v1205_v0  ;;  %851 = vmatprep.subr.bf16.mxu1 %v1205_v0 }
  0x5d   :  { %v372_v57 = vpack.c.bf16 %v371_v56, %v370_v55 }
  0x5f   :  { %812 = vmatpush3.bf16.msra.mxu0 %v1206_v1  ;;  %852 = vmatpush3.bf16.msra.mxu1 %v1206_v1 }
  0x60   :  { %813 = vmatprep.subr.bf16.mxu0 %v1205_v0  ;;  %853 = vmatprep.subr.bf16.mxu1 %v1205_v0 }
  0x63   :  { %814 = vmatpush3.bf16.msra.mxu0 %v1206_v1  ;;  %854 = vmatpush3.bf16.msra.mxu1 %v1206_v1 }
  0x64   :  { %815 = vmatprep.subr.bf16.mxu0 %v1205_v0  ;;  %855 = vmatprep.subr.bf16.mxu1 %v1205_v0 }
  0x67   :  { %816 = vmatpush3.bf16.msra.mxu0 %v1206_v1  ;;  %856 = vmatpush3.bf16.msra.mxu1 %v1206_v1 }
  0x68   :  { %821 = vmatprep.subr.bf16.mxu0 %v1205_v0  ;;  %861 = vmatprep.subr.bf16.mxu1 %v1205_v0 }
  0x6a   :  { %818 = vmatmul.mubr.bf16.vlgmr.msra.gmra.mrb[0].mxu0 %v86_v42  ;;  %858 = vmatmul.mubr.bf16.vlgmr.msra.gmra.mrb[0].mxu1 %v176_v43 }
  0x6b   :  { %822 = vmatpush3.bf16.msra.mxu0 %v1206_v1  ;;  %862 = vmatpush3.bf16.msra.mxu1 %v1206_v1 }
  0x6c   :  { %823 = vmatprep.subr.bf16.mxu0 %v1205_v0  ;;  %863 = vmatprep.subr.bf16.mxu1 %v1205_v0 }
  0x6d   :  { %837 = vmatprep.mubr.msk.bf16.mxu0 %vm1207_vm0, %v1205_v0  ;;  %877 = vmatprep.mubr.msk.bf16.mxu1 %vm1207_vm0, %v1205_v0 }
  0x6f   :  { %824 = vmatpush3.bf16.msra.mxu0 %v1206_v1  ;;  %864 = vmatpush3.bf16.msra.mxu1 %v1206_v1 }
  0x70   :  { %825 = vmatprep.subr.bf16.mxu0 %v1205_v0  ;;  %865 = vmatprep.subr.bf16.mxu1 %v1205_v0 }
  0x73   :  { %826 = vmatpush3.bf16.msra.mxu0 %v1206_v1  ;;  %866 = vmatpush3.bf16.msra.mxu1 %v1206_v1 }
  0x74   :  { %827 = vmatprep.subr.bf16.mxu0 %v1205_v0  ;;  %867 = vmatprep.subr.bf16.mxu1 %v1205_v0 }
  0x77   :  { %828 = vmatpush3.bf16.msra.mxu0 %v1206_v1  ;;  %868 = vmatpush3.bf16.msra.mxu1 %v1206_v1 }
  0x78   :  { %829 = vmatprep.subr.bf16.mxu0 %v1205_v0  ;;  %869 = vmatprep.subr.bf16.mxu1 %v1205_v0 }
  0x7b   :  { %830 = vmatpush3.bf16.msra.mxu0 %v1206_v1  ;;  %870 = vmatpush3.bf16.msra.mxu1 %v1206_v1 }
  0x7c   :  { %831 = vmatprep.subr.bf16.mxu0 %v1205_v0  ;;  %871 = vmatprep.subr.bf16.mxu1 %v1205_v0 }
  0x7f   :  { %832 = vmatpush3.bf16.msra.mxu0 %v1206_v1  ;;  %872 = vmatpush3.bf16.msra.mxu1 %v1206_v1 }
  0x80   :  { %833 = vmatprep.subr.bf16.mxu0 %v1205_v0  ;;  %873 = vmatprep.subr.bf16.mxu1 %v1205_v0 }
  0x83   :  { %834 = vmatpush3.bf16.msra.mxu0 %v1206_v1  ;;  %874 = vmatpush3.bf16.msra.mxu1 %v1206_v1 }
  0x84   :  { %835 = vmatprep.subr.bf16.mxu0 %v1205_v0  ;;  %875 = vmatprep.subr.bf16.mxu1 %v1205_v0 }
  0x87   :  { %836 = vmatpush3.bf16.msra.mxu0 %v1206_v1  ;;  %876 = vmatpush3.bf16.msra.mxu1 %v1206_v1 }
  0x88   :  { %881 = vmatprep.subr.bf16.mxu0 %v1205_v0  ;;  %921 = vmatprep.subr.bf16.mxu1 %v1205_v0 }
  0x8a   :  { %838 = vmatmul.mubr.bf16.vlgmr.msra.gmra.mrb[0].mxu0 %v1338_v17  ;;  %878 = vmatmul.mubr.bf16.vlgmr.msra.gmra.mrb[0].mxu1 %v1340_v18 }
  0x8b   :  { %882 = vmatpush3.bf16.msra.mxu0 %v1206_v1  ;;  %922 = vmatpush3.bf16.msra.mxu1 %v1206_v1 }
  0x8c   :  { %883 = vmatprep.subr.bf16.mxu0 %v1205_v0  ;;  %923 = vmatprep.subr.bf16.mxu1 %v1205_v0 }
  0x8d   :  { %897 = vmatprep.mubr.msk.bf16.mxu0 %vm1207_vm0, %v1205_v0  ;;  %937 = vmatprep.mubr.msk.bf16.mxu1 %vm1207_vm0, %v1205_v0 }
  0x8f   :  { %884 = vmatpush3.bf16.msra.mxu0 %v1206_v1  ;;  %924 = vmatpush3.bf16.msra.mxu1 %v1206_v1 }
  0x90   :  { %885 = vmatprep.subr.bf16.mxu0 %v1205_v0  ;;  %925 = vmatprep.subr.bf16.mxu1 %v1205_v0 }
  0x93   :  { %886 = vmatpush3.bf16.msra.mxu0 %v1206_v1  ;;  %926 = vmatpush3.bf16.msra.mxu1 %v1206_v1 }
  0x94   :  { %887 = vmatprep.subr.bf16.mxu0 %v1205_v0  ;;  %927 = vmatprep.subr.bf16.mxu1 %v1205_v0 }
  0x97   :  { %888 = vmatpush3.bf16.msra.mxu0 %v1206_v1  ;;  %928 = vmatpush3.bf16.msra.mxu1 %v1206_v1 }
  0x98   :  { %889 = vmatprep.subr.bf16.mxu0 %v1205_v0  ;;  %929 = vmatprep.subr.bf16.mxu1 %v1205_v0 }
  0x9b   :  { %890 = vmatpush3.bf16.msra.mxu0 %v1206_v1  ;;  %930 = vmatpush3.bf16.msra.mxu1 %v1206_v1 }
  0x9c   :  { %891 = vmatprep.subr.bf16.mxu0 %v1205_v0  ;;  %931 = vmatprep.subr.bf16.mxu1 %v1205_v0 }
  0x9f   :  { %892 = vmatpush3.bf16.msra.mxu0 %v1206_v1  ;;  %932 = vmatpush3.bf16.msra.mxu1 %v1206_v1 }
  0xa0   :  { %893 = vmatprep.subr.bf16.mxu0 %v1205_v0  ;;  %933 = vmatprep.subr.bf16.mxu1 %v1205_v0 }
  0xa3   :  { %894 = vmatpush3.bf16.msra.mxu0 %v1206_v1  ;;  %934 = vmatpush3.bf16.msra.mxu1 %v1206_v1 }
  0xa4   :  { %895 = vmatprep.subr.bf16.mxu0 %v1205_v0  ;;  %935 = vmatprep.subr.bf16.mxu1 %v1205_v0 }
  0xa7   :  { %896 = vmatpush3.bf16.msra.mxu0 %v1206_v1  ;;  %936 = vmatpush3.bf16.msra.mxu1 %v1206_v1 }
  0xa8   :  { %901 = vmatprep.subr.bf16.mxu0 %v1205_v0  ;;  %941 = vmatprep.subr.bf16.mxu1 %v1205_v0 }
  0xaa   :  { %898 = vmatmul.mubr.bf16.vlgmr.msra.gmra.mrb[4].mxu0 %v268_v19  ;;  %938 = vmatmul.mubr.bf16.vlgmr.msra.gmra.mrb[4].mxu1 %v372_v57 }
  0xab   :  { %902 = vmatpush3.bf16.msra.mxu0 %v1206_v1  ;;  %942 = vmatpush3.bf16.msra.mxu1 %v1206_v1 }
  0xac   :  { %903 = vmatprep.subr.bf16.mxu0 %v1205_v0  ;;  %943 = vmatprep.subr.bf16.mxu1 %v1205_v0 }
  0xad   :  { %917 = vmatprep.mubr.msk.bf16.mxu0 %vm1207_vm0, %v1205_v0  ;;  %957 = vmatprep.mubr.msk.bf16.mxu1 %vm1207_vm0, %v1205_v0 }
  0xaf   :  { %904 = vmatpush3.bf16.msra.mxu0 %v1206_v1  ;;  %944 = vmatpush3.bf16.msra.mxu1 %v1206_v1 }
  0xb0   :  { %905 = vmatprep.subr.bf16.mxu0 %v1205_v0  ;;  %945 = vmatprep.subr.bf16.mxu1 %v1205_v0 }
  0xb3   :  { %906 = vmatpush3.bf16.msra.mxu0 %v1206_v1  ;;  %946 = vmatpush3.bf16.msra.mxu1 %v1206_v1 }
  0xb4   :  { %907 = vmatprep.subr.bf16.mxu0 %v1205_v0  ;;  %947 = vmatprep.subr.bf16.mxu1 %v1205_v0 }
  0xb7   :  { %908 = vmatpush3.bf16.msra.mxu0 %v1206_v1  ;;  %948 = vmatpush3.bf16.msra.mxu1 %v1206_v1 }
  0xb8   :  { %909 = vmatprep.subr.bf16.mxu0 %v1205_v0  ;;  %949 = vmatprep.subr.bf16.mxu1 %v1205_v0 }
  0xbb   :  { %910 = vmatpush3.bf16.msra.mxu0 %v1206_v1  ;;  %950 = vmatpush3.bf16.msra.mxu1 %v1206_v1 }
  0xbc   :  { %911 = vmatprep.subr.bf16.mxu0 %v1205_v0  ;;  %951 = vmatprep.subr.bf16.mxu1 %v1205_v0 }
  0xbf   :  { %912 = vmatpush3.bf16.msra.mxu0 %v1206_v1  ;;  %952 = vmatpush3.bf16.msra.mxu1 %v1206_v1 }
  0xc0   :  { %913 = vmatprep.subr.bf16.mxu0 %v1205_v0  ;;  %953 = vmatprep.subr.bf16.mxu1 %v1205_v0 }
  0xc3   :  { %914 = vmatpush3.bf16.msra.mxu0 %v1206_v1  ;;  %954 = vmatpush3.bf16.msra.mxu1 %v1206_v1 }
  0xc4   :  { %915 = vmatprep.subr.bf16.mxu0 %v1205_v0  ;;  %955 = vmatprep.subr.bf16.mxu1 %v1205_v0 }
  0xc7   :  { %916 = vmatpush3.bf16.msra.mxu0 %v1206_v1  ;;  %956 = vmatpush3.bf16.msra.mxu1 %v1206_v1 }
  0xc8   :  { %961 = vmatprep.subr.bf16.mxu0 %v1205_v0  ;;  %1001 = vmatprep.subr.bf16.mxu1 %v1205_v0 }
  0xca   :  { %918 = vmatmul.mubr.bf16.vlgmr.msra.gmra.mrb[4].mxu0 %v1326_v8  ;;  %958 = vmatmul.mubr.bf16.vlgmr.msra.gmra.mrb[4].mxu1 %v367_v52 }
  0xcb   :  { %962 = vmatpush3.bf16.msra.mxu0 %v1206_v1  ;;  %1002 = vmatpush3.bf16.msra.mxu1 %v1206_v1 }
  0xcc   :  { %963 = vmatprep.subr.bf16.mxu0 %v1205_v0  ;;  %1003 = vmatprep.subr.bf16.mxu1 %v1205_v0 }
  0xcd   :  { %977 = vmatprep.mubr.msk.bf16.mxu0 %vm1207_vm0, %v1205_v0  ;;  %1017 = vmatprep.mubr.msk.bf16.mxu1 %vm1207_vm0, %v1205_v0 }
  0xcf   :  { %964 = vmatpush3.bf16.msra.mxu0 %v1206_v1  ;;  %1004 = vmatpush3.bf16.msra.mxu1 %v1206_v1 }
  0xd0   :  { %965 = vmatprep.subr.bf16.mxu0 %v1205_v0  ;;  %1005 = vmatprep.subr.bf16.mxu1 %v1205_v0 }
  0xd3   :  { %966 = vmatpush3.bf16.msra.mxu0 %v1206_v1  ;;  %1006 = vmatpush3.bf16.msra.mxu1 %v1206_v1 }
  0xd4   :  { %967 = vmatprep.subr.bf16.mxu0 %v1205_v0  ;;  %1007 = vmatprep.subr.bf16.mxu1 %v1205_v0 }
  0xd7   :  { %968 = vmatpush3.bf16.msra.mxu0 %v1206_v1  ;;  %1008 = vmatpush3.bf16.msra.mxu1 %v1206_v1 }
  0xd8   :  { %969 = vmatprep.subr.bf16.mxu0 %v1205_v0  ;;  %1009 = vmatprep.subr.bf16.mxu1 %v1205_v0 }
  0xdb   :  { %970 = vmatpush3.bf16.msra.mxu0 %v1206_v1  ;;  %1010 = vmatpush3.bf16.msra.mxu1 %v1206_v1 }
  0xdc   :  { %971 = vmatprep.subr.bf16.mxu0 %v1205_v0  ;;  %1011 = vmatprep.subr.bf16.mxu1 %v1205_v0 }
  0xdf   :  { %972 = vmatpush3.bf16.msra.mxu0 %v1206_v1  ;;  %1012 = vmatpush3.bf16.msra.mxu1 %v1206_v1 }
  0xe0   :  { %973 = vmatprep.subr.bf16.mxu0 %v1205_v0  ;;  %1013 = vmatprep.subr.bf16.mxu1 %v1205_v0 }
  0xe3   :  { %974 = vmatpush3.bf16.msra.mxu0 %v1206_v1  ;;  %1014 = vmatpush3.bf16.msra.mxu1 %v1206_v1 }
  0xe4   :  { %975 = vmatprep.subr.bf16.mxu0 %v1205_v0  ;;  %1015 = vmatprep.subr.bf16.mxu1 %v1205_v0 }
  0xe7   :  { %976 = vmatpush3.bf16.msra.mxu0 %v1206_v1  ;;  %1016 = vmatpush3.bf16.msra.mxu1 %v1206_v1 }
  0xe8   :  { %981 = vmatprep.subr.bf16.mxu0 %v1205_v0  ;;  %1021 = vmatprep.subr.bf16.mxu1 %v1205_v0 }
  0xea   :  { %978 = vmatmul.mubr.bf16.vlgmr.msra.gmra.mrb[8].mxu0 %v462_v48  ;;  %1018 = vmatmul.mubr.bf16.vlgmr.msra.gmra.mrb[8].mxu1 %v554_v49 }
  0xeb   :  { %982 = vmatpush3.bf16.msra.mxu0 %v1206_v1  ;;  %1022 = vmatpush3.bf16.msra.mxu1 %v1206_v1 }
  0xec   :  { %983 = vmatprep.subr.bf16.mxu0 %v1205_v0  ;;  %1023 = vmatprep.subr.bf16.mxu1 %v1205_v0 }
  0xed   :  { %997 = vmatprep.mubr.msk.bf16.mxu0 %vm1207_vm0, %v1205_v0  ;;  %1037 = vmatprep.mubr.msk.bf16.mxu1 %vm1207_vm0, %v1205_v0 }
  0xef   :  { %984 = vmatpush3.bf16.msra.mxu0 %v1206_v1  ;;  %1024 = vmatpush3.bf16.msra.mxu1 %v1206_v1 }
  0xf0   :  { %985 = vmatprep.subr.bf16.mxu0 %v1205_v0  ;;  %1025 = vmatprep.subr.bf16.mxu1 %v1205_v0 }
  0xf3   :  { %986 = vmatpush3.bf16.msra.mxu0 %v1206_v1  ;;  %1026 = vmatpush3.bf16.msra.mxu1 %v1206_v1 }
  0xf4   :  { %987 = vmatprep.subr.bf16.mxu0 %v1205_v0  ;;  %1027 = vmatprep.subr.bf16.mxu1 %v1205_v0 }
  0xf7   :  { %988 = vmatpush3.bf16.msra.mxu0 %v1206_v1  ;;  %1028 = vmatpush3.bf16.msra.mxu1 %v1206_v1 }
  0xf8   :  { %989 = vmatprep.subr.bf16.mxu0 %v1205_v0  ;;  %1029 = vmatprep.subr.bf16.mxu1 %v1205_v0 }
  0xfb   :  { %990 = vmatpush3.bf16.msra.mxu0 %v1206_v1  ;;  %1030 = vmatpush3.bf16.msra.mxu1 %v1206_v1 }
  0xfc   :  { %991 = vmatprep.subr.bf16.mxu0 %v1205_v0  ;;  %1031 = vmatprep.subr.bf16.mxu1 %v1205_v0 }
  0xff   :  { %992 = vmatpush3.bf16.msra.mxu0 %v1206_v1  ;;  %1032 = vmatpush3.bf16.msra.mxu1 %v1206_v1 }
 0x100   :  { %993 = vmatprep.subr.bf16.mxu0 %v1205_v0  ;;  %1033 = vmatprep.subr.bf16.mxu1 %v1205_v0 }
 0x103   :  { %994 = vmatpush3.bf16.msra.mxu0 %v1206_v1  ;;  %1034 = vmatpush3.bf16.msra.mxu1 %v1206_v1 }
 0x104   :  { %995 = vmatprep.subr.bf16.mxu0 %v1205_v0  ;;  %1035 = vmatprep.subr.bf16.mxu1 %v1205_v0 }
 0x107   :  { %996 = vmatpush3.bf16.msra.mxu0 %v1206_v1  ;;  %1036 = vmatpush3.bf16.msra.mxu1 %v1206_v1 }
 0x10a   :  { %998 = vmatmul.mubr.bf16.vlgmr.msra.gmra.mrb[8].mxu0 %v1374_v36  ;;  %1038 = vmatmul.mubr.bf16.vlgmr.msra.gmra.mrb[8].mxu1 %v1376_v37 }
 0x15d   :  { %v162_v58 = vpop.f32.mrb[0].mxu0  ;;  %v252_v59 = vpop.f32.mrb[0].mxu1 }
 0x15e   :  { %v839_v60 = vpop.f32.mrb[1].mxu0  ;;  %v879_v61 = vpop.f32.mrb[1].mxu1  ;;  %v259_v4 = vmax.f32 %v252_v59, 1e-24 }
 0x15f   :  { %v165_v62 = vpop.f32.mrb[2].mxu0  ;;  %v255_v63 = vpop.f32.mrb[2].mxu1 }
 0x160   :  { %v840_v2 = vpop.f32.mrb[3].mxu0  ;;  %v880_v3 = vpop.f32.mrb[3].mxu1  ;;  %v260_v5 = vmax.f32 %v255_v63, 1e-24  ;;  %1077 = vrsqrt.f32 %v259_v4 }
 0x16a   :  { %v1078_v14 = vpop.eup %1077 }
 0x19d   :  { %v344_v6 = vpop.f32.mrb[4].mxu0  ;;  %v448_v0 = vpop.f32.mrb[4].mxu1 }
 0x19e   :  { %v351_v7 = vmax.f32 %v344_v6, 1e-24  ;;  %v919_v8 = vpop.f32.mrb[5].mxu0  ;;  %v959_v9 = vpop.f32.mrb[5].mxu1 }
 0x19f   :  { %v347_v1 = vpop.f32.mrb[6].mxu0  ;;  %v451_v10 = vpop.f32.mrb[6].mxu1 }
 0x1a0   :  { %1079 = vrsqrt.f32 %v351_v7  ;;  %v352_v11 = vmax.f32 %v347_v1, 1e-24  ;;  %v920_v12 = vpop.f32.mrb[7].mxu0  ;;  %v960_v13 = vpop.f32.mrb[7].mxu1 }
 0x1a1   :  { %1081 = vrsqrt.f32 %v260_v5 }
 0x1a2   :  { %1083 = vrsqrt.f32 %v352_v11 }
 0x1aa   :  { %v1080_v15 = vpop.eup %1079 }
 0x1ab   :  { %v1082_v16 = vpop.eup %1081  ;;  %v357_v17 = vmul.f32 %v1080_v15, %v1078_v14 }
 0x1ac   :  { %v1084_v18 = vpop.eup %1083 }
 0x1ad   :  { %v358_v19 = vmul.f32 %v1084_v18, %v1082_v16  ;;  %v359_v20 = vmul.f32 %v357_v17, %v162_v58 }
 0x1af   :  { %v360_v21 = vmul.f32 %v358_v19, %v165_v62 }
 0x1dd   :  { %v538_v22 = vpop.f32.mrb[8].mxu0  ;;  %v630_v23 = vpop.f32.mrb[8].mxu1 }
 0x1de   :  { %v545_v24 = vmax.f32 %v538_v22, 1e-24  ;;  %v637_v25 = vmax.f32 %v630_v23, 1e-24  ;;  %v999_v26 = vpop.f32.mrb[9].mxu0  ;;  %v1039_v27 = vpop.f32.mrb[9].mxu1 }
 0x1df   :  { %v541_v28 = vpop.f32.mrb[10].mxu0  ;;  %v633_v29 = vpop.f32.mrb[10].mxu1 }
 0x1e0   :  { %1085 = vrsqrt.f32 %v545_v24  ;;  %v546_v30 = vmax.f32 %v541_v28, 1e-24  ;;  %v638_v31 = vmax.f32 %v633_v29, 1e-24  ;;  %v1000_v32 = vpop.f32.mrb[11].mxu0  ;;  %v1040_v33 = vpop.f32.mrb[11].mxu1 }
 0x1e1   :  { %1087 = vrsqrt.f32 %v637_v25 }
 0x1e2   :  { %1089 = vrsqrt.f32 %v546_v30 }
 0x1e3   :  { %1091 = vrsqrt.f32 %v638_v31 }
 0x1ea   :  { %v1086_v34 = vpop.eup %1085 }
 0x1eb   :  { %v1088_v35 = vpop.eup %1087 }
 0x1ec   :  { %v1090_v36 = vpop.eup %1089  ;;  %v643_v37 = vmul.f32 %v1088_v35, %v1086_v34 }
 0x1ed   :  { %v1092_v38 = vpop.eup %1091 }
 0x1ee   :  { %v644_v39 = vmul.f32 %v1092_v38, %v1090_v36  ;;  %v645_v40 = vmul.f32 %v643_v37, %v448_v0 }
 0x1f0   :  { %v646_v41 = vmul.f32 %v644_v39, %v451_v10  ;;  %v647_v42 = vadd.f32 %v645_v40, %v359_v20 }
 0x1f2   :  { %v648_v43 = vadd.f32 %v646_v41, %v360_v21  ;;  %v649_v44 = vsub.f32 2.0, %v647_v42 }
 0x1f4   :  { %v650_v45 = vsub.f32 2.0, %v648_v43  ;;  %v663_v46 = vsel %vm662_vm1, %v649_v44, 0.0 }
 0x1f6   :  { %v664_v47 = vsel %vm662_vm1, %v650_v45, 0.0 }
 0x1f7   :  { %v665_v48 = vadd.f32 %v664_v47, %v663_v46 }
 0x1f9   :  { %666 = vadd.xlane.f32.xlu0 %v665_v48 }
 0x286   :  { %v667_v49 = vpop.xlane.xlu0 %666 }
 0x287   :  { %v668_v50 = vrot.slane %v667_v49, 4 }
 0x289   :  { %v669_v51 = vadd.f32 %v668_v50, %v667_v49 }
 0x28b   :  { %v670_v52 = vrot.slane %v669_v51, 2 }
 0x28d   :  { %v671_v53 = vadd.f32 %v670_v52, %v669_v51 }
 0x28f   :  { %v672_v54 = vrot.slane %v671_v53, 1 }
 0x291   :  { %v673_v55 = vadd.f32 %v672_v54, %v671_v53 }
 0x293   :  { %1065 = vpush %v673_v55 }
 0x2c4   :  { %s1066_s3 = spop %1065 }
 0x2c5   :  { %676 = sst [smem:[#allocation10]] %s1066_s3 }
 0x2c6   :  { %1190 = shalt.err (!%p1187_p6)
}
 0x2c7   :  { %s1208_s16 = smov [#allocation10]  }
 0x2c8   :  { %684 = dma.smem_to_hbm %s1208_s16, 16, %s1612_s4, [#allocation4]  }
 0x2c9   :  { %1197 = dma.done.wait [#allocation4], 16  }
 0x2ca   :  { %1198 = vsyncadd [#allocation4], 4294967280 }
 0x2cb   :  { %688 = sfence }
 0x2cc   :  { %689 = vsyncpa [#allocation3], 1 }
 0x2cd   :  { %690 = vsyncpa [#allocation6], 1 }
 0x2ce   :  { %691 = vsyncpa [#allocation9], 1 }
 0x2cf   :  { %692 = vsyncpa [#allocation4], 1 }

</bundles_post_ra>
